<compile_context>
chip_gen: v5e
topology: v5e:2x2
jax: 0.10.0
libtpu: 0.0.40
codegen_flags: <defaults>
</compile_context>

<pallas_src>
import functools

import jax
import jax.numpy as jnp
from jax.experimental import pallas as pl
from jax.experimental.pallas import tpu as pltpu


def _conv_down_kernel(c_ref, w_ref, o_ref, *, n_taps_h, stride, w_out, p):
    """Fused conv-as-matmul + InstanceNorm(affine=False, eps=1e-5) + LeakyReLU(0.2).

    c_ref: (stride, K*Cin, R*W_out)   bf16  phase-decomposed padded input (one sample)
    w_ref: (K, cout_tile, K*Cin)      bf16  weights grouped by vertical tap
    o_ref: (cout_tile, P)             f32   P = H_out * W_out  (lane-dense last dim)
    """
    acc = jnp.zeros(o_ref.shape, jnp.float32)
    # 3 accumulated MXU matmuls; slices are static (offset 0 or W_out) along the lane dim.
    for ki in range(n_taps_h):
        a = ki % stride            # row phase
        oh = ki // stride          # row offset inside the phase grid
        rhs = c_ref[a, :, pl.ds(oh * w_out, p)]                  # (K*Cin, P)
        acc = acc + jnp.dot(w_ref[ki], rhs, preferred_element_type=jnp.float32)

    # InstanceNorm2d(affine=False, track_running_stats=False): biased variance over spatial
    # positions per (sample, channel). One-pass stats: var = E[y^2] - E[y]^2.
    mean = jnp.mean(acc, axis=1, keepdims=True)
    mean_sq = jnp.mean(acc * acc, axis=1, keepdims=True)
    var = mean_sq - mean * mean
    y = (acc - mean) * jax.lax.rsqrt(var + 1e-5)

    # LeakyReLU(0.2)
    o_ref[...] = jnp.where(y >= 0, y, 0.2 * y).astype(o_ref.dtype)


def _pick_cout_tile(cout):
    if cout <= 256:
        return cout
    for t in (256, 128, 64, 32, 16, 8):
        if cout % t == 0:
            return t
    return cout


def conv_down_block(x_nchw, weight, bias, *, stride=2, padding=1):
    """x_nchw: (N, Cin, H, W); weight: (Cout, Cin, K, K); bias: (Cout,) -> (N, Cout, H/2, W/2)."""
    # The conv bias is mathematically cancelled by InstanceNorm's mean subtraction and does not
    # affect the variance, so it is dead compute -> dropped.
    del bias
    N, Cin, H, W = x_nchw.shape
    Cout, _, K, Kw = weight.shape
    assert K == Kw
    assert stride == 2 and padding == 1 and K == 3, "phase decomposition written for module defaults"

    H_out = (H + 2 * padding - K) // stride + 1
    W_out = (W + 2 * padding - K) // stride + 1
    P = H_out * W_out
    R = H_out + (K - 1) // stride          # rows kept per row-phase grid
    Q = R * W_out
    kcin = K * Cin

    # --- glue (plain JAX): pad + stride-phase decomposition, ~1.5x input bytes in bf16.
    # C[n, a, kj*Cin + ci, r*W_out + j] = xpad[n, ci, stride*r + a, stride*j + kj]
    xp = jnp.pad(x_nchw, ((0, 0), (0, 0), (padding, padding), (padding, padding)))
    phase_blocks = []
    for a in range(stride):
        per_kj = [
            xp[:, :, a:a + stride * R:stride, kj:kj + stride * W_out:stride]   # (N, Cin, R, W_out)
            for kj in range(K)
        ]
        ca = jnp.concatenate(per_kj, axis=1)                                    # (N, K*Cin, R, W_out)
        phase_blocks.append(ca.reshape(N, kcin, Q))
    c_all = jnp.stack(phase_blocks, axis=1).astype(jnp.bfloat16)                # (N, stride, K*Cin, Q)

    # weight (Cout, Cin, K, K) -> (K_h, Cout, K_w*Cin), matching the kj-major / ci-minor channel
    # order of c_all; bf16 for the MXU.
    w_r = jnp.transpose(weight, (2, 0, 3, 1)).reshape(K, Cout, kcin).astype(jnp.bfloat16)

    cout_tile = _pick_cout_tile(Cout)
    n_ct = Cout // cout_tile

    # VMEM budget sized from the tiles (double-buffer factor + headroom), capped for v7x.
    c_bytes = stride * kcin * Q * 2
    w_bytes = K * cout_tile * kcin * 2
    o_bytes = cout_tile * P * 4
    vmem_limit = int(min(64 << 20, max(16 << 20, 2 * (c_bytes + w_bytes + o_bytes) + (4 << 20))))

    kernel = functools.partial(_conv_down_kernel, n_taps_h=K, stride=stride, w_out=W_out, p=P)

    out_flat = pl.pallas_call(
        kernel,
        out_shape=jax.ShapeDtypeStruct((N, Cout, P), jnp.float32),
        grid_spec=pltpu.PrefetchScalarGridSpec(
            num_scalar_prefetch=0,
            grid=(N, n_ct),
            in_specs=[
                # Whole-sample phase slab; block index only depends on n, so it stays resident
                # across the inner Cout-tile axis (no re-fetch).
                pl.BlockSpec((None, stride, kcin, Q), lambda n, c: (n, 0, 0, 0)),
                pl.BlockSpec((K, cout_tile, kcin), lambda n, c: (0, c, 0)),
            ],
            out_specs=pl.BlockSpec((None, cout_tile, P), lambda n, c: (n, c, 0)),
        ),
        compiler_params=pltpu.CompilerParams(
            dimension_semantics=("parallel", "parallel"),
            vmem_limit_bytes=vmem_limit,
        ),
    )(c_all, w_r)

    # (N, Cout, P) -> NCHW is a pure reshape (no transpose).
    return out_flat.reshape(N, Cout, H_out, W_out)


if __name__ == "__main__":
    # Small deterministic example consistent with the module's forward.
    N, Cin, H, W = 2, 4, 16, 16
    Cout, K = 8, 3

    key = jax.random.PRNGKey(0)
    kx, kw, kb = jax.random.split(key, 3)

    x = jax.random.normal(kx, (N, Cin, H, W), dtype=jnp.float32)
    fan_in = Cin * K * K
    bound = 1.0 / (fan_in ** 0.5)
    weight = jax.random.uniform(kw, (Cout, Cin, K, K), minval=-bound, maxval=bound,
                                dtype=jnp.float32)
    bias = jax.random.uniform(kb, (Cout,), minval=-bound, maxval=bound, dtype=jnp.float32)

    out = conv_down_block(x, weight, bias, stride=2, padding=1)
    out = jax.block_until_ready(out)
    assert out.shape == (N, Cout, H // 2, W // 2)

    # Reference (includes the conv bias; InstanceNorm cancels it, so results must still match).
    conv = jax.lax.conv_general_dilated(
        x, weight, window_strides=(2, 2), padding=((1, 1), (1, 1)),
        dimension_numbers=("NCHW", "OIHW", "NCHW")) + bias[None, :, None, None]
    mean = conv.mean(axis=(2, 3), keepdims=True)
    var = conv.var(axis=(2, 3), keepdims=True)
    ref = (conv - mean) * jax.lax.rsqrt(var + 1e-5)
    ref = jnp.where(ref >= 0, ref, 0.2 * ref)

    err = float(jnp.max(jnp.abs(out - ref)))
    assert err < 5e-2, f"max abs error {err}"
    print("KERNEL_OK")
</pallas_src>

<mosaic_0001>
module attributes {stable_mosaic.version = 11 : i64} {
  func.func @_conv_down_kernel(%arg0: i32, %arg1: i32, %arg2: memref<1x2x12x72xbf16, #tpu.memory_space<vmem>>, %arg3: memref<3x8x12xbf16, #tpu.memory_space<vmem>>, %arg4: memref<1x8x64xf32, #tpu.memory_space<vmem>>) attributes {dimension_semantics = [#tpu.dimension_semantics<parallel>, #tpu.dimension_semantics<parallel>], iteration_bounds = array<i64: 2, 1>, scalar_prefetch = 0 : i64, scratch_operands = 0 : i64, tpu.core_type = #tpu.core_type<tc>, window_params = [{transform_indices = @transform_0, window_bounds = array<i64: 1, 2, 12, 72>}, {transform_indices = @transform_1, window_bounds = array<i64: 3, 8, 12>}, {transform_indices = @transform_2, window_bounds = array<i64: 1, 8, 64>}]} {
    %cst = arith.constant 0.000000e+00 : f32
    %0 = vector.broadcast %cst : f32 to vector<8x64xf32>
    %c0 = arith.constant 0 : index
    %c0_0 = arith.constant 0 : index
    %c0_1 = arith.constant 0 : index
    %c0_2 = arith.constant 0 : index
    %1 = vector.load %arg2[%c0, %c0_0, %c0_1, %c0_2] : memref<1x2x12x72xbf16, #tpu.memory_space<vmem>>, vector<1x1x12x64xbf16>
    %2 = vector.shape_cast %1 : vector<1x1x12x64xbf16> to vector<12x64xbf16>
    %c0_3 = arith.constant 0 : index
    %c0_4 = arith.constant 0 : index
    %c0_5 = arith.constant 0 : index
    %3 = vector.load %arg3[%c0_3, %c0_4, %c0_5] : memref<3x8x12xbf16, #tpu.memory_space<vmem>>, vector<1x8x12xbf16>
    %4 = vector.shape_cast %3 : vector<1x8x12xbf16> to vector<8x12xbf16>
    %cst_6 = arith.constant dense<0.000000e+00> : vector<8x64xf32>
    %5 = tpu.matmul %4, %2, %cst_6 {dimension_numbers = #tpu.dot_dimension_numbers<[1], [0], [0], [1], [0, 0, 1, 1], [], []>} : vector<8x12xbf16>, vector<12x64xbf16>, vector<8x64xf32> -> vector<8x64xf32>
    %6 = arith.addf %0, %5 : vector<8x64xf32>
    %c0_7 = arith.constant 0 : index
    %c1 = arith.constant 1 : index
    %c0_8 = arith.constant 0 : index
    %c0_9 = arith.constant 0 : index
    %7 = vector.load %arg2[%c0_7, %c1, %c0_8, %c0_9] : memref<1x2x12x72xbf16, #tpu.memory_space<vmem>>, vector<1x1x12x64xbf16>
    %8 = vector.shape_cast %7 : vector<1x1x12x64xbf16> to vector<12x64xbf16>
    %c1_10 = arith.constant 1 : index
    %c0_11 = arith.constant 0 : index
    %c0_12 = arith.constant 0 : index
    %9 = vector.load %arg3[%c1_10, %c0_11, %c0_12] : memref<3x8x12xbf16, #tpu.memory_space<vmem>>, vector<1x8x12xbf16>
    %10 = vector.shape_cast %9 : vector<1x8x12xbf16> to vector<8x12xbf16>
    %cst_13 = arith.constant dense<0.000000e+00> : vector<8x64xf32>
    %11 = tpu.matmul %10, %8, %cst_13 {dimension_numbers = #tpu.dot_dimension_numbers<[1], [0], [0], [1], [0, 0, 1, 1], [], []>} : vector<8x12xbf16>, vector<12x64xbf16>, vector<8x64xf32> -> vector<8x64xf32>
    %12 = arith.addf %6, %11 : vector<8x64xf32>
    %c0_14 = arith.constant 0 : index
    %c0_15 = arith.constant 0 : index
    %c0_16 = arith.constant 0 : index
    %c8 = arith.constant 8 : index
    %13 = vector.load %arg2[%c0_14, %c0_15, %c0_16, %c8] : memref<1x2x12x72xbf16, #tpu.memory_space<vmem>>, vector<1x1x12x64xbf16>
    %14 = vector.shape_cast %13 : vector<1x1x12x64xbf16> to vector<12x64xbf16>
    %c2 = arith.constant 2 : index
    %c0_17 = arith.constant 0 : index
    %c0_18 = arith.constant 0 : index
    %15 = vector.load %arg3[%c2, %c0_17, %c0_18] : memref<3x8x12xbf16, #tpu.memory_space<vmem>>, vector<1x8x12xbf16>
    %16 = vector.shape_cast %15 : vector<1x8x12xbf16> to vector<8x12xbf16>
    %cst_19 = arith.constant dense<0.000000e+00> : vector<8x64xf32>
    %17 = tpu.matmul %16, %14, %cst_19 {dimension_numbers = #tpu.dot_dimension_numbers<[1], [0], [0], [1], [0, 0, 1, 1], [], []>} : vector<8x12xbf16>, vector<12x64xbf16>, vector<8x64xf32> -> vector<8x64xf32>
    %18 = arith.addf %12, %17 : vector<8x64xf32>
    %cst_20 = arith.constant dense<0.000000e+00> : vector<8xf32>
    %19 = vector.multi_reduction <add>, %18, %cst_20 [1] : vector<8x64xf32> to vector<8xf32>
    %20 = vector.shape_cast %19 : vector<8xf32> to vector<8x1xf32>
    %cst_21 = arith.constant 6.400000e+01 : f32
    %21 = vector.broadcast %cst_21 : f32 to vector<8x1xf32>
    %22 = arith.divf %20, %21 : vector<8x1xf32>
    %23 = arith.mulf %18, %18 : vector<8x64xf32>
    %cst_22 = arith.constant dense<0.000000e+00> : vector<8xf32>
    %24 = vector.multi_reduction <add>, %23, %cst_22 [1] : vector<8x64xf32> to vector<8xf32>
    %25 = vector.shape_cast %24 : vector<8xf32> to vector<8x1xf32>
    %cst_23 = arith.constant 6.400000e+01 : f32
    %26 = vector.broadcast %cst_23 : f32 to vector<8x1xf32>
    %27 = arith.divf %25, %26 : vector<8x1xf32>
    %28 = arith.mulf %22, %22 : vector<8x1xf32>
    %29 = arith.subf %27, %28 : vector<8x1xf32>
    %30 = vector.broadcast %22 : vector<8x1xf32> to vector<8x64xf32>
    %31 = arith.subf %18, %30 : vector<8x64xf32>
    %cst_24 = arith.constant 9.99999974E-6 : f32
    %32 = vector.broadcast %cst_24 : f32 to vector<8x1xf32>
    %33 = arith.addf %29, %32 : vector<8x1xf32>
    %34 = math.rsqrt %33 : vector<8x1xf32>
    %35 = vector.broadcast %34 : vector<8x1xf32> to vector<8x64xf32>
    %36 = arith.mulf %31, %35 : vector<8x64xf32>
    %cst_25 = arith.constant 0.000000e+00 : f32
    %37 = vector.broadcast %cst_25 : f32 to vector<8x64xf32>
    %38 = arith.cmpf oge, %36, %37 : vector<8x64xf32>
    %cst_26 = arith.constant 2.000000e-01 : f32
    %39 = vector.broadcast %cst_26 : f32 to vector<8x64xf32>
    %40 = arith.mulf %39, %36 : vector<8x64xf32>
    %41 = arith.select %38, %36, %40 : vector<8x64xi1>, vector<8x64xf32>
    %c0_27 = arith.constant 0 : index
    %c0_28 = arith.constant 0 : index
    %c0_29 = arith.constant 0 : index
    %42 = vector.load %arg4[%c0_27, %c0_28, %c0_29] : memref<1x8x64xf32, #tpu.memory_space<vmem>>, vector<1x8x64xf32>
    %43 = vector.shape_cast %42 : vector<1x8x64xf32> to vector<8x64xf32>
    %44 = vector.shape_cast %41 : vector<8x64xf32> to vector<1x8x64xf32>
    tpu.vector_store %arg4[%c0_27, %c0_28, %c0_29], %44 {strides = array<i32>} : memref<1x8x64xf32, #tpu.memory_space<vmem>>, vector<1x8x64xf32>,
    return
  }
  func.func @transform_0(%arg0: i32, %arg1: i32) -> (i32, i32, i32, i32) {
    %c0_i32 = arith.constant 0 : i32
    %c0_i32_0 = arith.constant 0 : i32
    %c0_i32_1 = arith.constant 0 : i32
    %c0_i32_2 = arith.constant 0 : i32
    return %arg0, %c0_i32, %c0_i32_0, %c0_i32_1 : i32, i32, i32, i32
  }
  func.func @transform_1(%arg0: i32, %arg1: i32) -> (i32, i32, i32) {
    %c0_i32 = arith.constant 0 : i32
    %c0_i32_0 = arith.constant 0 : i32
    %c0_i32_1 = arith.constant 0 : i32
    return %c0_i32, %arg1, %c0_i32_0 : i32, i32, i32
  }
  func.func @transform_2(%arg0: i32, %arg1: i32) -> (i32, i32, i32) {
    %c0_i32 = arith.constant 0 : i32
    %c0_i32_0 = arith.constant 0 : i32
    return %arg0, %arg1, %c0_i32 : i32, i32, i32
  }
}

</mosaic_0001>

<bundles_post_ra>
// kernel: tpu_custom_call.1
= control target key start
LH: loop header
LB: loop body
LE: loop exit
PB: predicated region body
PF: predicated region fallthrough
CT: control target
= control target key end

     0   :  { %7 = vsyncpa [#allocation3], 0  ;;  %s693_s0 = inlined_call_operand.vmem [shape: bf16[2,2,12,72], index: 0, kind: input, shape index: {}]   ;;  %s694_s1 = inlined_call_operand.vmem [shape: bf16[3,8,12], index: 1, kind: input, shape index: {}]   ;;  %s695_s2 = inlined_call_operand.hbm [shape: f32[2,8,64], index: 2, kind: output, shape index: {}]  }
   0x1   :  { %9 = vsyncpa [#allocation3 + $0x1], 0  ;;  %s581_s9 = smov 0   ;;  %s583_s10 = smov 0  }
   0x2   :  { %s585_s11 = smov 0   ;;  %s587_s12 = smov 0  }
   0x3   :  { %s589_s13 = smov 0   ;;  %s591_s14 = smov 0  }
   0x4 LB: > { %s392_s15 = sadd.s32 4294967295, %s562_s14   ;;  %s393_s16 = sadd.s32 4294967294, %s562_s14   ;;  %s562_s14 = sphi %s591_s14, %s15_s14   ;;  %s558_s13 = sphi %s589_s13, %s702_s13   ;;  %s554_s12 = sphi %s587_s12, %s701_s12   ;;  %s550_s11 = sphi %s585_s11, %s700_s11   ;;  %s546_s10 = sphi %s583_s10, %s699_s10   ;;  %s542_s9 = sphi %s581_s9, %s698_s9  }
   0x5   : > { %s27_s17 = sadd.s32 1, %s558_s13  ;;  %s88_s18 = sadd.s32 1, %s550_s11 }
   0x6   : > { %p29_p0 = scmp.ge.s32.totalorder %s27_s17, 2  ;;  %p98_p1 = scmp.ne.s32.totalorder %s550_s11, %s546_s10 }
   0x7   : > { %p99_p2 = scmp.eq.s32.totalorder %s392_s15, 1  ;;  %p104_p3 = scmp.ne.s32.totalorder %s546_s10, %s542_s9 }
   0x8   : > { %s704_s17 = smov (%p29_p0, %s27_s17), 0  ;;  %p105_p5 = scmp.eq.s32.totalorder %s393_s16, 1 }
   0x9   : > { %p621_p4 = por %p99_p2, %p98_p1  ;;  %s83_s20 = ssub.s32 %s558_s13, %s704_s17 }
   0xa   : > { %p397_p6 = scmp.ge.s32.totalorder %s562_s14, 1  ;;  %p86_p7 = scmp.eq.s32.totalorder %s83_s20, 0 }
   0xb   : > { %p628_p8 = por %p105_p5, %p104_p3  ;;  %p138_p9 = scmp.lt.s32.totalorder %s562_s14, 3 }
   0xc   : > { %s634_s22 = scalar_select %p86_p7, %s550_s11, %s88_s18  }
   0xd   : > { %p139_p10 = pnand %p397_p6, %p138_p9 }
   0xe   : > { %p164_p11 = scmp.lt.s32.totalorder (!%p139_p10), %s554_s12, 1  ;;  %s564_s28 = smov (!%p139_p10), 120  }
   0xf   : > { %142 = sbr.rel (%p139_p10) target bundleno = 431 (0x1af), region = 28  ;;  %s161_s7 = sand.u32 (!%p139_p10), 1, %s546_s10  }
  0x10   : > { %s398_s8 = sshll.u32 (!%p139_p10), %s161_s7, 3  ;;  %s417_s15 = sshll.u32 (!%p139_p10), %s554_s12, 3 }
  0x11   : > { %s304_s20 = scalar_lea.hbm (!%p139_p10), %s695_s2, %s417_s15  ;;  %s504_s30 = scalar_lea.hbm (!%p139_p10), %s695_s2, 16 }
  0x12   : > { %s308_s25 = sshll.u32 (!%p139_p10), %s304_s20, 4  ;;  %s309_s25 = int_to_ptr.hbm [resolvable:$true] %s308_s25 }
  0x13   : > { %s498_s26 = sshra.s32 (!%p139_p10), %s309_s25, 4  ;;  %s499_s26 = int_to_ptr.hbm [resolvable:$true] %s498_s26 }
  0x14   : > { %s165_s23 = scalar_select %p164_p11, %s554_s12, 1  ;;  %vm191_vm0 = vcmask 1045504   ;;  %v403_v8 = vld [vmem:[%s694_s1 + $0x4] sm:$0xf]  ;;  %vm187_vm1 = vcmask 97280   ;;  %vm256_vm2 = vcmask 523264  }
  0x15   : > { %v176_v9 = vld [vmem:[%s694_s1] sm:$0xf]  ;;  %v414_v12 = vld [vmem:[%s694_s1 + $0x8] sm:$0xf]  ;;  %v565_v24 = vmov 64.0   ;;  %s293_s12 = scalar_lea.sflag [#allocation3], %s161_s7  ;;  %p505_p1 = scmp.lt.s32.totalorder %s499_s26, %s695_s2 }
  0x16   : > { %s420_s24 = sshll.u32 %s165_s23, 4  ;;  %480 = vrcp.f32 %v565_v24  ;;  %s163_s23 = scalar_lea.vmem [#allocation2], %s398_s8 }
  0x17   : > { %s168_s27 = scalar_lea.vmem %s693_s0, %s420_s24  ;;  %s306_s24 = sshll.u32 %s163_s23, 4  ;;  %s307_s24 = int_to_ptr.vmem [resolvable:$true] %s306_s24 }
  0x18   : > { %v411_v0 = vld [vmem:[%s168_s27] sm:$0xf]  ;;  %v421_v1 = vld [vmem:[%s168_s27] sm:$0x30]  ;;  %v406_v2 = vld [vmem:[%s168_s27 + $0x8] sm:$0xf] }
  0x19   : > { %v412_v3 = vor.u32 %v421_v1, %v411_v0  ;;  %v422_v4 = vld [vmem:[%s168_s27 + $0x8] sm:$0x30]  ;;  %s500_s27 = scalar_lea.hbm %s499_s26, 8 }
  0x1a   : > { %v407_v5 = vor.u32 %v422_v4, %v406_v2  ;;  %p501_p12 = scmp.ne.s32.totalorder %s499_s26, %s500_s27  ;;  %p506_p2 = scmp.lt.s32.totalorder %s504_s30, %s500_s27 }
  0x1b   : > { %234 = vrot.lane.b32.xlu0 %v412_v3, %s564_s28  ;;  %v217_v6 = vsel %vm191_vm0, %v412_v3, 0 }
  0x1c   : > { %v193_v7 = vsel %vm191_vm0, %v407_v5, 0  ;;  %226 = vmatpush.bf16.msra.mxu1 %v217_v6  ;;  %v481_v25 = vpop.eup %480  ;;  %p502_p13 = pnand %p501_p12, %p621_p4  ;;  %p507_p3 = por %p506_p2, %p505_p1 }
  0x1d   : > { %202 = vmatpush.bf16.msra.mxu0 %v193_v7  ;;  %v261_v26 = vmul.f32 64.0, %v481_v25  ;;  %vm265_vm3 = vweird.f32 %v481_v25 }
  0x1e   : > { %p503_p0 = pneg %p502_p13 }
  0x1f   : > { %413 = vmatmul.msk.bf16.vlgmr.msra.gmra.mxu1 %vm187_vm1, %v176_v9  ;;  %v262_v27 = vsub.f32 1.0, %v261_v26 }
  0x20   : > { %408 = vmatmul.msk.bf16.vlgmr.msra.gmra.mxu0 %vm187_vm1, %v403_v8  ;;  %p508_p5 = pnand %p507_p3, %p503_p0 }
  0x21   : > { %v263_v28 = vmul.f32 %v481_v25, %v262_v27 }
  0x23   : > { %v264_v29 = vadd.f32 %v481_v25, %v263_v28 }
  0x25   : > { %v266_v30 = vsel %vm265_vm3, %v481_v25, %v264_v29 }
  0x8d   : > { %v235_v10 = vpop.permute.xlu0 %234 }
  0x8e   : > { %v240_v11 = vsel %vm191_vm0, %v235_v10, 0 }
  0x8f   : > { %249 = vmatpush.bf16.msra.mxu2 %v240_v11 }
  0x92   : > { %415 = vmatmul.msk.bf16.vlgmr.msra.gmra.mxu2 %vm187_vm1, %v414_v12 }
  0x9c   : > { %v228_v14 = vpop.f32.mrf.mxu1 }
  0x9d   : > { %v204_v13 = vpop.f32.mrf.mxu0 }
  0x9e   : > { %v229_v17 = vadd.f32 %v228_v14, %v204_v13 }
  0xa4   : > { %v230_v16 = vpop.f32.mrf.mxu1 }
  0xa5   : > { %v206_v15 = vpop.f32.mrf.mxu0 }
 0x115   : > { %v251_v18 = vpop.f32.mrf.mxu2 }
 0x116   : > { %v255_v19 = vadd.f32 %v251_v18, %v229_v17 }
 0x118   : > { %v257_v20 = vsel %vm256_vm2, %v255_v19, 0.0  ;;  %v268_v21 = vmul.f32 %v255_v19, %v255_v19 }
 0x119   : > { %258 = vadd.xlane.f32.xlu0 %v257_v20 }
 0x11a   : > { %v269_v22 = vsel %vm256_vm2, %v268_v21, 0.0 }
 0x11b   : > { %270 = vadd.xlane.f32.xlu1 %v269_v22 }
 0x11d   : > { %v253_v23 = vpop.f32.mrf.mxu2 }
 0x18c   : > { %v259_v31 = vpop.xlane.xlu0 %258 }
 0x18d   : > { %v267_v32 = vmul.f32 %v266_v30, %v259_v31 }
 0x18e   : > { %v271_v33 = vpop.xlane.xlu1 %270 }
 0x18f   : > { %v273_v34 = vmul.f32 %v267_v32, %v267_v32  ;;  %v272_v35 = vmul.f32 %v271_v33, %v266_v30  ;;  %v275_v44 = vsub.f32 %v255_v19, %v267_v32 }
 0x191   : > { %v274_v36 = vsub.f32 %v272_v35, %v273_v34 }
 0x193   : > { %v276_v37 = vadd.f32 1e-05, %v274_v36 }
 0x195   : > { %482 = vrsqrt.f32 %v276_v37  ;;  %vm283_vm5 = vweird.f32 %v276_v37 }
 0x19b   : > { %v483_v38 = vpop.eup %482 }
 0x19c   : > { %v278_v39 = vmul.f32 %v483_v38, %v276_v37  ;;  %vm284_vm4 = vweird.f32 %v483_v38 }
 0x19d   : > { %vm285_vm6 = vmor %vm283_vm5, %vm284_vm4 }
 0x19e   : > { %v279_v40 = vmul.f32 %v483_v38, %v278_v39 }
 0x1a0   : > { %v280_v41 = vmul.f32 0.5, %v279_v40 }
 0x1a2   : > { %v281_v42 = vsub.f32 1.5, %v280_v41 }
 0x1a4   : > { %v282_v43 = vmul.f32 %v483_v38, %v281_v42 }
 0x1a6   : > { %v286_v45 = vsel %vm285_vm6, %v483_v38, %v282_v43 }
 0x1a7   : > { %v287_v46 = vmul.f32 %v286_v45, %v275_v44 }
 0x1a9   : > { %vm288_vm7 = vcmp.ge.f32.partialorder %v287_v46, 0.0  ;;  %v289_v47 = vmul.f32 0.2, %v287_v46 }
 0x1ab   : > { %v290_v48 = vsel %vm288_vm7, %v287_v46, %v289_v47 }
 0x1ac   : > { %291 = vst.msk [vmem:[%s163_s23] sm:$0xff] %vm256_vm2, %v290_v48 }
 0x1ad   : > { %511 = shalt.err (!%p508_p5)
}
 0x1ae   : > { %423 = dma.vmem_to_hbm [thread:$0]  (%p621_p4), %s307_s24, 128, %s309_s25, %s293_s12  }
 0x1af PF: > { %p429_p6 = scmp.ge.s32.totalorder %s562_s14, 2  ;;  %s320_s5 = sand.u32 1, %s542_s9  }
 0x1b0   : > { %s321_s6 = scalar_lea.sflag [#allocation3], %s320_s5 }
 0x1b1   : > { %p426_p7 = pnand %p429_p6, %p628_p8 }
 0x1b3   : > { %p427_p9 = pneg %p426_p7 }
 0x1b5   : > { %537 = dma.done.wait (%p427_p9), %s321_s6, 128  }
 0x1b6   : > { %539 = vsyncadd (%p427_p9), %s321_s6, 4294967168  ;;  %s15_s14 = sadd.s32 1, %s562_s14   ;;  %s698_s9 = smov %s546_s10 }
 0x1b7   : > { %p12_p10 = scmp.ge.s32.totalorder %s15_s14, 4   ;;  %s699_s10 = smov %s550_s11 }
 0x1b8   : > { %s700_s11 = smov %s634_s22  ;;  %s701_s12 = smov %s558_s13 }
 0x1b9   : > { %s702_s13 = smov %s704_s17  ;;  %14 = sbr.rel (!%p12_p10) target bundleno = 4 (0x4), region = 69 }
 0x1be   :  { %327 = vsyncpa [#allocation3], 1 }
 0x1bf   :  { %329 = vsyncpa [#allocation3 + $0x1], 1 }

</bundles_post_ra>
